<compile_context>
chip_gen: v7x
topology: tpu7x:2x2x1
jax: 0.10.0
libtpu: 0.0.40
codegen_flags: <defaults>
</compile_context>

<pallas_src>
import jax
import jax.numpy as jnp
from jax import lax
from jax.experimental import pallas as pl
from jax.experimental.pallas import tpu as pltpu


def _fold_bn(w_oihw, bias, gamma, beta, mean, var, eps):
    """Fold conv bias + eval-mode BatchNorm into the conv weights.

    Returns (w_hwio_scaled, bias_folded) with
        BN(conv(x, w) + bias) == conv(x, w_scaled) + bias_folded.
    """
    s = gamma * lax.rsqrt(var.astype(jnp.float32) + eps)          # (Cout,)
    w_hwio = jnp.transpose(w_oihw, (2, 3, 1, 0)).astype(jnp.float32)
    return w_hwio * s, ((bias - mean) * s + beta).astype(jnp.float32)


def _banded_weights(w_hwio, out_w, d1, col_shift, lhs_cols):
    """Expand HWIO conv weights into per-row-tap banded (Toeplitz) matrices.

    band[kh, j*Cin + ci, w*Cout + co] = w_hwio[kh, kw, ci, co]
        with j = w + kw*d1 + col_shift, entries with j outside [0, lhs_cols)
        clipped (their input is an implicit SAME zero).

    Multiplying a channels-minor input row-slab (M, lhs_cols*Cin) by band[kh]
    and summing over kh performs the full (kw, ci) contraction of a SAME conv
    and yields a natively lane-dense (M, out_w*Cout) result.
    """
    KH, KW, Cin, Cout = w_hwio.shape
    band = jnp.zeros((KH, lhs_cols * Cin, out_w * Cout), jnp.float32)
    for kw in range(KW):
        for w in range(out_w):
            j = w + kw * d1 + col_shift
            if 0 <= j < lhs_cols:
                band = band.at[:, j * Cin:(j + 1) * Cin,
                               w * Cout:(w + 1) * Cout].set(w_hwio[:, kw])
    return band


def _make_res_block_kernel(Bt, KH, d0, H, W, Cin, Cout, Wp, f_l, f_r, t_l):
    """Kernel for a batch tile: conv1+BN1, +residual, row-halo pad, conv2+BN2."""
    M = Bt * H
    W_in, W_out, L_in = W * Cin, W * Cout, Wp * Cin

    def kernel(x_ref, band1_ref, b1_ref, band2_ref, b2_ref, o_ref, c1pad_ref):
        # x_ref:     (Bt, H+fp, Wp*Cin)   SAME-padded input, channels-minor
        # band1_ref: (KH, Wp*Cin, W*Cin)  conv1 Toeplitz weights (BN folded)
        # b1_ref:    (1, W*Cin)           conv1 folded bias, tiled over W
        # band2_ref: (KH, W*Cin, W*Cout)  conv2 Toeplitz weights, kw-clipped
        # b2_ref:    (1, W*Cout)          conv2 folded bias, tiled over W
        # o_ref:     (Bt, H, W*Cout)      lane-dense output block
        # c1pad_ref: VMEM (Bt, H+fp, W*Cin) scratch: row-halo-padded conv1 out

        # ---- conv1 + BN1: KH matmuls with M = Bt*H rows ----
        acc1 = None
        for kh in range(KH):
            slab = x_ref[:, kh * d0:kh * d0 + H, :].reshape(M, L_in)
            part = jnp.dot(slab, band1_ref[kh],
                           preferred_element_type=jnp.float32)
            acc1 = part if acc1 is None else acc1 + part

        # residual add (exact, f32): un-padded input in the same row/lane layout
        resid = x_ref[:, f_l:f_l + H,
                      t_l * Cin:t_l * Cin + W_in].reshape(M, W_in)
        c1 = acc1 + b1_ref[...] + resid.astype(jnp.float32)

        # ---- stash c1 with its SAME row halo; only halo rows are zeroed ----
        if f_l:
            c1pad_ref[:, :f_l, :] = jnp.zeros((Bt, f_l, W_in), c1pad_ref.dtype)
        if f_r:
            c1pad_ref[:, f_l + H:, :] = jnp.zeros((Bt, f_r, W_in),
                                                  c1pad_ref.dtype)
        c1pad_ref[:, f_l:f_l + H, :] = c1.reshape(Bt, H, W_in).astype(
            c1pad_ref.dtype)

        # ---- conv2 + BN2: KH matmuls (lane halo handled by band clipping) ----
        acc2 = None
        for kh in range(KH):
            slab = c1pad_ref[:, kh * d0:kh * d0 + H, :].reshape(M, W_in)
            part = jnp.dot(slab, band2_ref[kh],
                           preferred_element_type=jnp.float32)
            acc2 = part if acc2 is None else acc2 + part

        o_ref[...] = (acc2 + b2_ref[...]).reshape(Bt, H, W_out).astype(
            o_ref.dtype)

    return kernel


def res_convblock_forward(x_nchw, conv1_params, conv2_params, *,
                          dilation=(1, 1), eps=1e-5,
                          use_bf16_matmul_inputs=False, target_m_rows=256):
    """Res_ConvBlock forward (2-D): NCHW in, NCHW out (matches nn.Conv2d I/O)."""
    w1, b1, g1, be1, m1, v1 = conv1_params
    w2, b2, g2, be2, m2, v2 = conv2_params
    N, Cin, H, W = x_nchw.shape
    Cout = w2.shape[0]
    KH, KW = w1.shape[2], w1.shape[3]
    d0, d1 = dilation

    # SAME padding exactly as the module computes it (asymmetric when odd).
    fp, tp = (KH - 1) * d0, (KW - 1) * d1
    f_l, t_l = fp // 2, tp // 2
    f_r, t_r = fp - f_l, tp - t_l
    Hp, Wp = H + fp, W + tp

    # Batch tile: fill ~target_m_rows MXU rows per grid step, but keep >= 2
    # grid steps whenever N > 1 so both v7x TensorCores get a tile.
    bt = max(1, min(N, max(1, target_m_rows // max(H, 1))))
    if N > 1:
        bt = min(bt, (N + 1) // 2)
    n_tiles = -(-N // bt)
    Np = n_tiles * bt

    # Fold eval-mode BatchNorm + conv bias into the weights (host side).
    w1f, b1f = _fold_bn(w1, b1, g1, be1, m1, v1, eps)   # (KH,KW,Cin,Cin), (Cin,)
    w2f, b2f = _fold_bn(w2, b2, g2, be2, m2, v2, eps)   # (KH,KW,Cin,Cout), (Cout,)

    # Single layout change on the input: NCHW -> NHWC, single SAME pad, batch
    # pad to a multiple of the tile, collapse (W, C) into a channels-minor
    # lane axis.  XLA fuses transpose+pad+reshape into one copy.
    x2d = jnp.transpose(x_nchw, (0, 2, 3, 1)).astype(jnp.float32)
    x2d = jnp.pad(x2d, ((0, Np - N), (f_l, f_r), (t_l, t_r), (0, 0)))
    x2d = x2d.reshape(Np, Hp, Wp * Cin)

    band1 = _banded_weights(w1f, W, d1, 0, Wp)      # (KH, Wp*Cin, W*Cin)
    band2 = _banded_weights(w2f, W, d1, -t_l, W)    # (KH, W*Cin,  W*Cout), clipped
    b1t = jnp.tile(b1f, W)[None, :]                 # (1, W*Cin)
    b2t = jnp.tile(b2f, W)[None, :]                 # (1, W*Cout)

    compute_dtype = jnp.float32
    if use_bf16_matmul_inputs:
        # v6e/v7x option: bf16 MXU operands, f32 accumulation (looser numerics).
        compute_dtype = jnp.bfloat16
        x2d = x2d.astype(jnp.bfloat16)
        band1 = band1.astype(jnp.bfloat16)
        band2 = band2.astype(jnp.bfloat16)

    kernel = _make_res_block_kernel(bt, KH, d0, H, W, Cin, Cout, Wp,
                                    f_l, f_r, t_l)

    # Advisory cost (true conv math, not the Toeplitz-expanded FLOPs).
    flops = 2 * N * H * W * KH * KW * Cin * (Cin + Cout)
    op_itemsize = 2 if use_bf16_matmul_inputs else 4
    bytes_accessed = (op_itemsize * (x2d.size + band1.size + band2.size)
                      + 4 * (b1t.size + b2t.size)
                      + x_nchw.dtype.itemsize * Np * H * W * Cout)

    out2d = pl.pallas_call(
        kernel,
        out_shape=jax.ShapeDtypeStruct((Np, H, W * Cout), x_nchw.dtype),
        grid=(n_tiles,),
        in_specs=[
            pl.BlockSpec((bt, Hp, Wp * Cin), lambda n: (n, 0, 0)),
            pl.BlockSpec(band1.shape, lambda n: (0, 0, 0)),
            pl.BlockSpec(b1t.shape, lambda n: (0, 0)),
            pl.BlockSpec(band2.shape, lambda n: (0, 0, 0)),
            pl.BlockSpec(b2t.shape, lambda n: (0, 0)),
        ],
        out_specs=pl.BlockSpec((bt, H, W * Cout), lambda n: (n, 0, 0)),
        scratch_shapes=[pltpu.VMEM((bt, Hp, W * Cin), compute_dtype)],
        compiler_params=pltpu.CompilerParams(
            dimension_semantics=("parallel",)),
        cost_estimate=pl.CostEstimate(flops=int(flops), transcendentals=0,
                                      bytes_accessed=int(bytes_accessed)),
    )(x2d, band1, b1t, band2, b2t)

    # Single layout change on the output: un-collapse lanes, drop batch pad,
    # NHWC -> NCHW.
    out = out2d.reshape(Np, H, W, Cout)[:N]
    return jnp.transpose(out, (0, 3, 1, 2))


# ----------------------------- pure-JAX reference ---------------------------
def _conv_bn_ref(x_nchw, w_oihw, bias, gamma, beta, mean, var, dilation, eps):
    KH, KW = w_oihw.shape[2], w_oihw.shape[3]
    d0, d1 = dilation
    fp, tp = (KH - 1) * d0, (KW - 1) * d1
    f_l, t_l = fp // 2, tp // 2
    x = jnp.transpose(x_nchw, (0, 2, 3, 1))
    x = jnp.pad(x, ((0, 0), (f_l, fp - f_l), (t_l, tp - t_l), (0, 0)))
    w = jnp.transpose(w_oihw, (2, 3, 1, 0))
    y = lax.conv_general_dilated(x, w, (1, 1), 'VALID', rhs_dilation=(d0, d1),
                                 dimension_numbers=('NHWC', 'HWIO', 'NHWC'))
    y = y + bias
    y = (y - mean) * lax.rsqrt(var + eps) * gamma + beta
    return jnp.transpose(y, (0, 3, 1, 2))


def _res_convblock_reference(x, p1, p2, dilation=(1, 1), eps=1e-5):
    c1 = _conv_bn_ref(x, *p1, dilation, eps) + x
    return _conv_bn_ref(c1, *p2, dilation, eps)


if __name__ == "__main__":
    N, Cin, Cout, H, W, K = 2, 4, 8, 16, 16, 3

    def make_conv_params(key, cin, cout, k):
        kw, kb, kg, kbe, km, kv = jax.random.split(key, 6)
        return (0.1 * jax.random.normal(kw, (cout, cin, k, k), jnp.float32),
                0.1 * jax.random.normal(kb, (cout,), jnp.float32),
                1.0 + 0.1 * jax.random.normal(kg, (cout,), jnp.float32),
                0.1 * jax.random.normal(kbe, (cout,), jnp.float32),
                0.1 * jax.random.normal(km, (cout,), jnp.float32),
                jnp.abs(jax.random.normal(kv, (cout,), jnp.float32)) + 0.5)

    key = jax.random.PRNGKey(0)
    k1, k2, kx = jax.random.split(key, 3)
    p1 = make_conv_params(k1, Cin, Cin, K)    # conv1: in_ch -> in_ch
    p2 = make_conv_params(k2, Cin, Cout, K)   # conv2: in_ch -> out_ch
    x = jax.random.normal(kx, (N, Cin, H, W), jnp.float32)

    fwd = jax.jit(res_convblock_forward)
    out = jax.block_until_ready(fwd(x, p1, p2))

    ref = _res_convblock_reference(x, p1, p2)
    assert out.shape == (N, Cout, H, W)
    err = float(jnp.max(jnp.abs(out - ref)))
    assert jnp.allclose(out, ref, atol=1e-4, rtol=1e-4), \
        f"mismatch vs reference (max |err|={err})"

    print("KERNEL_OK")
</pallas_src>

<mosaic_0001>
module attributes {stable_mosaic.version = 11 : i64} {
  func.func @kernel(%arg0: i32, %arg1: memref<1x18x72xf32, #tpu.memory_space<vmem>>, %arg2: memref<3x72x64xf32, #tpu.memory_space<vmem>>, %arg3: memref<1x64xf32, #tpu.memory_space<vmem>>, %arg4: memref<3x64x128xf32, #tpu.memory_space<vmem>>, %arg5: memref<1x128xf32, #tpu.memory_space<vmem>>, %arg6: memref<1x16x128xf32, #tpu.memory_space<vmem>>, %arg7: memref<1x18x64xf32, #tpu.memory_space<vmem>>) attributes {dimension_semantics = [#tpu.dimension_semantics<parallel>], iteration_bounds = array<i64: 2>, scalar_prefetch = 0 : i64, scratch_operands = 1 : i64, tpu.core_type = #tpu.core_type<tc>, window_params = [{transform_indices = @transform_0, window_bounds = array<i64: 1, 18, 72>}, {pipeline_mode = #tpu.pipeline_mode<synchronous>, transform_indices = @transform_1, window_bounds = array<i64: 3, 72, 64>}, {pipeline_mode = #tpu.pipeline_mode<synchronous>, transform_indices = @transform_2, window_bounds = array<i64: 1, 64>}, {pipeline_mode = #tpu.pipeline_mode<synchronous>, transform_indices = @transform_3, window_bounds = array<i64: 3, 64, 128>}, {pipeline_mode = #tpu.pipeline_mode<synchronous>, transform_indices = @transform_4, window_bounds = array<i64: 1, 128>}, {transform_indices = @transform_5, window_bounds = array<i64: 1, 16, 128>}]} {
    %c0 = arith.constant 0 : index
    %c0_0 = arith.constant 0 : index
    %c0_1 = arith.constant 0 : index
    %0 = vector.load %arg1[%c0, %c0_0, %c0_1] : memref<1x18x72xf32, #tpu.memory_space<vmem>>, vector<1x16x72xf32>
    %1 = vector.shape_cast %0 : vector<1x16x72xf32> to vector<16x72xf32>
    %c0_2 = arith.constant 0 : index
    %c0_3 = arith.constant 0 : index
    %c0_4 = arith.constant 0 : index
    %2 = vector.load %arg2[%c0_2, %c0_3, %c0_4] : memref<3x72x64xf32, #tpu.memory_space<vmem>>, vector<1x72x64xf32>
    %3 = vector.shape_cast %2 : vector<1x72x64xf32> to vector<72x64xf32>
    %cst = arith.constant dense<0.000000e+00> : vector<16x64xf32>
    %4 = tpu.matmul %1, %3, %cst {dimension_numbers = #tpu.dot_dimension_numbers<[1], [0], [0], [1], [0, 0, 1, 1], [], []>} : vector<16x72xf32>, vector<72x64xf32>, vector<16x64xf32> -> vector<16x64xf32>
    %c0_5 = arith.constant 0 : index
    %c1 = arith.constant 1 : index
    %c0_6 = arith.constant 0 : index
    %5 = vector.load %arg1[%c0_5, %c1, %c0_6] : memref<1x18x72xf32, #tpu.memory_space<vmem>>, vector<1x16x72xf32>
    %6 = vector.shape_cast %5 : vector<1x16x72xf32> to vector<16x72xf32>
    %c1_7 = arith.constant 1 : index
    %c0_8 = arith.constant 0 : index
    %c0_9 = arith.constant 0 : index
    %7 = vector.load %arg2[%c1_7, %c0_8, %c0_9] : memref<3x72x64xf32, #tpu.memory_space<vmem>>, vector<1x72x64xf32>
    %8 = vector.shape_cast %7 : vector<1x72x64xf32> to vector<72x64xf32>
    %cst_10 = arith.constant dense<0.000000e+00> : vector<16x64xf32>
    %9 = tpu.matmul %6, %8, %cst_10 {dimension_numbers = #tpu.dot_dimension_numbers<[1], [0], [0], [1], [0, 0, 1, 1], [], []>} : vector<16x72xf32>, vector<72x64xf32>, vector<16x64xf32> -> vector<16x64xf32>
    %10 = arith.addf %4, %9 : vector<16x64xf32>
    %c0_11 = arith.constant 0 : index
    %c2 = arith.constant 2 : index
    %c0_12 = arith.constant 0 : index
    %11 = vector.load %arg1[%c0_11, %c2, %c0_12] : memref<1x18x72xf32, #tpu.memory_space<vmem>>, vector<1x16x72xf32>
    %12 = vector.shape_cast %11 : vector<1x16x72xf32> to vector<16x72xf32>
    %c2_13 = arith.constant 2 : index
    %c0_14 = arith.constant 0 : index
    %c0_15 = arith.constant 0 : index
    %13 = vector.load %arg2[%c2_13, %c0_14, %c0_15] : memref<3x72x64xf32, #tpu.memory_space<vmem>>, vector<1x72x64xf32>
    %14 = vector.shape_cast %13 : vector<1x72x64xf32> to vector<72x64xf32>
    %cst_16 = arith.constant dense<0.000000e+00> : vector<16x64xf32>
    %15 = tpu.matmul %12, %14, %cst_16 {dimension_numbers = #tpu.dot_dimension_numbers<[1], [0], [0], [1], [0, 0, 1, 1], [], []>} : vector<16x72xf32>, vector<72x64xf32>, vector<16x64xf32> -> vector<16x64xf32>
    %16 = arith.addf %10, %15 : vector<16x64xf32>
    %c0_17 = arith.constant 0 : index
    %c1_18 = arith.constant 1 : index
    %c4 = arith.constant 4 : index
    %17 = vector.load %arg1[%c0_17, %c1_18, %c4] : memref<1x18x72xf32, #tpu.memory_space<vmem>>, vector<1x16x64xf32>
    %18 = vector.shape_cast %17 : vector<1x16x64xf32> to vector<16x64xf32>
    %c0_19 = arith.constant 0 : index
    %c0_20 = arith.constant 0 : index
    %19 = vector.load %arg3[%c0_19, %c0_20] : memref<1x64xf32, #tpu.memory_space<vmem>>, vector<1x64xf32>
    %20 = vector.broadcast %19 : vector<1x64xf32> to vector<16x64xf32>
    %21 = arith.addf %16, %20 : vector<16x64xf32>
    %22 = arith.addf %21, %18 : vector<16x64xf32>
    %cst_21 = arith.constant 0.000000e+00 : f32
    %23 = vector.broadcast %cst_21 : f32 to vector<1x1x64xf32>
    %c0_22 = arith.constant 0 : index
    %c0_23 = arith.constant 0 : index
    %c0_24 = arith.constant 0 : index
    %24 = vector.load %arg7[%c0_22, %c0_23, %c0_24] : memref<1x18x64xf32, #tpu.memory_space<vmem>>, vector<1x1x64xf32>
    tpu.vector_store %arg7[%c0_22, %c0_23, %c0_24], %23 {strides = array<i32>} : memref<1x18x64xf32, #tpu.memory_space<vmem>>, vector<1x1x64xf32>,
    %cst_25 = arith.constant 0.000000e+00 : f32
    %25 = vector.broadcast %cst_25 : f32 to vector<1x1x64xf32>
    %c0_26 = arith.constant 0 : index
    %c17 = arith.constant 17 : index
    %c0_27 = arith.constant 0 : index
    %26 = vector.load %arg7[%c0_26, %c17, %c0_27] : memref<1x18x64xf32, #tpu.memory_space<vmem>>, vector<1x1x64xf32>
    tpu.vector_store %arg7[%c0_26, %c17, %c0_27], %25 {strides = array<i32>} : memref<1x18x64xf32, #tpu.memory_space<vmem>>, vector<1x1x64xf32>,
    %27 = vector.shape_cast %22 : vector<16x64xf32> to vector<1x16x64xf32>
    %c0_28 = arith.constant 0 : index
    %c1_29 = arith.constant 1 : index
    %c0_30 = arith.constant 0 : index
    %28 = vector.load %arg7[%c0_28, %c1_29, %c0_30] : memref<1x18x64xf32, #tpu.memory_space<vmem>>, vector<1x16x64xf32>
    tpu.vector_store %arg7[%c0_28, %c1_29, %c0_30], %27 {strides = array<i32>} : memref<1x18x64xf32, #tpu.memory_space<vmem>>, vector<1x16x64xf32>,
    %c0_31 = arith.constant 0 : index
    %c0_32 = arith.constant 0 : index
    %c0_33 = arith.constant 0 : index
    %29 = vector.load %arg7[%c0_31, %c0_32, %c0_33] : memref<1x18x64xf32, #tpu.memory_space<vmem>>, vector<1x16x64xf32>
    %30 = vector.shape_cast %29 : vector<1x16x64xf32> to vector<16x64xf32>
    %c0_34 = arith.constant 0 : index
    %c0_35 = arith.constant 0 : index
    %c0_36 = arith.constant 0 : index
    %31 = vector.load %arg4[%c0_34, %c0_35, %c0_36] : memref<3x64x128xf32, #tpu.memory_space<vmem>>, vector<1x64x128xf32>
    %32 = vector.shape_cast %31 : vector<1x64x128xf32> to vector<64x128xf32>
    %cst_37 = arith.constant dense<0.000000e+00> : vector<16x128xf32>
    %33 = tpu.matmul %30, %32, %cst_37 {dimension_numbers = #tpu.dot_dimension_numbers<[1], [0], [0], [1], [0, 0, 1, 1], [], []>} : vector<16x64xf32>, vector<64x128xf32>, vector<16x128xf32> -> vector<16x128xf32>
    %c0_38 = arith.constant 0 : index
    %c1_39 = arith.constant 1 : index
    %c0_40 = arith.constant 0 : index
    %34 = vector.load %arg7[%c0_38, %c1_39, %c0_40] : memref<1x18x64xf32, #tpu.memory_space<vmem>>, vector<1x16x64xf32>
    %35 = vector.shape_cast %34 : vector<1x16x64xf32> to vector<16x64xf32>
    %c1_41 = arith.constant 1 : index
    %c0_42 = arith.constant 0 : index
    %c0_43 = arith.constant 0 : index
    %36 = vector.load %arg4[%c1_41, %c0_42, %c0_43] : memref<3x64x128xf32, #tpu.memory_space<vmem>>, vector<1x64x128xf32>
    %37 = vector.shape_cast %36 : vector<1x64x128xf32> to vector<64x128xf32>
    %cst_44 = arith.constant dense<0.000000e+00> : vector<16x128xf32>
    %38 = tpu.matmul %35, %37, %cst_44 {dimension_numbers = #tpu.dot_dimension_numbers<[1], [0], [0], [1], [0, 0, 1, 1], [], []>} : vector<16x64xf32>, vector<64x128xf32>, vector<16x128xf32> -> vector<16x128xf32>
    %39 = arith.addf %33, %38 : vector<16x128xf32>
    %c0_45 = arith.constant 0 : index
    %c2_46 = arith.constant 2 : index
    %c0_47 = arith.constant 0 : index
    %40 = vector.load %arg7[%c0_45, %c2_46, %c0_47] : memref<1x18x64xf32, #tpu.memory_space<vmem>>, vector<1x16x64xf32>
    %41 = vector.shape_cast %40 : vector<1x16x64xf32> to vector<16x64xf32>
    %c2_48 = arith.constant 2 : index
    %c0_49 = arith.constant 0 : index
    %c0_50 = arith.constant 0 : index
    %42 = vector.load %arg4[%c2_48, %c0_49, %c0_50] : memref<3x64x128xf32, #tpu.memory_space<vmem>>, vector<1x64x128xf32>
    %43 = vector.shape_cast %42 : vector<1x64x128xf32> to vector<64x128xf32>
    %cst_51 = arith.constant dense<0.000000e+00> : vector<16x128xf32>
    %44 = tpu.matmul %41, %43, %cst_51 {dimension_numbers = #tpu.dot_dimension_numbers<[1], [0], [0], [1], [0, 0, 1, 1], [], []>} : vector<16x64xf32>, vector<64x128xf32>, vector<16x128xf32> -> vector<16x128xf32>
    %45 = arith.addf %39, %44 : vector<16x128xf32>
    %c0_52 = arith.constant 0 : index
    %c0_53 = arith.constant 0 : index
    %46 = vector.load %arg5[%c0_52, %c0_53] : memref<1x128xf32, #tpu.memory_space<vmem>>, vector<1x128xf32>
    %47 = vector.broadcast %46 : vector<1x128xf32> to vector<16x128xf32>
    %48 = arith.addf %45, %47 : vector<16x128xf32>
    %49 = vector.shape_cast %48 : vector<16x128xf32> to vector<1x16x128xf32>
    %c0_54 = arith.constant 0 : index
    %c0_55 = arith.constant 0 : index
    %c0_56 = arith.constant 0 : index
    %50 = vector.load %arg6[%c0_54, %c0_55, %c0_56] : memref<1x16x128xf32, #tpu.memory_space<vmem>>, vector<1x16x128xf32>
    tpu.vector_store %arg6[%c0_54, %c0_55, %c0_56], %49 {strides = array<i32>} : memref<1x16x128xf32, #tpu.memory_space<vmem>>, vector<1x16x128xf32>,
    return
  }
  func.func @transform_0(%arg0: i32) -> (i32, i32, i32) {
    %c0_i32 = arith.constant 0 : i32
    %c0_i32_0 = arith.constant 0 : i32
    %c0_i32_1 = arith.constant 0 : i32
    return %arg0, %c0_i32, %c0_i32_0 : i32, i32, i32
  }
  func.func @transform_1(%arg0: i32) -> (i32, i32, i32) {
    %c0_i32 = arith.constant 0 : i32
    %c0_i32_0 = arith.constant 0 : i32
    %c0_i32_1 = arith.constant 0 : i32
    %c0_i32_2 = arith.constant 0 : i32
    return %c0_i32, %c0_i32_0, %c0_i32_1 : i32, i32, i32
  }
  func.func @transform_2(%arg0: i32) -> (i32, i32) {
    %c0_i32 = arith.constant 0 : i32
    %c0_i32_0 = arith.constant 0 : i32
    %c0_i32_1 = arith.constant 0 : i32
    return %c0_i32, %c0_i32_0 : i32, i32
  }
  func.func @transform_3(%arg0: i32) -> (i32, i32, i32) {
    %c0_i32 = arith.constant 0 : i32
    %c0_i32_0 = arith.constant 0 : i32
    %c0_i32_1 = arith.constant 0 : i32
    %c0_i32_2 = arith.constant 0 : i32
    return %c0_i32, %c0_i32_0, %c0_i32_1 : i32, i32, i32
  }
  func.func @transform_4(%arg0: i32) -> (i32, i32) {
    %c0_i32 = arith.constant 0 : i32
    %c0_i32_0 = arith.constant 0 : i32
    %c0_i32_1 = arith.constant 0 : i32
    return %c0_i32, %c0_i32_0 : i32, i32
  }
  func.func @transform_5(%arg0: i32) -> (i32, i32, i32) {
    %c0_i32 = arith.constant 0 : i32
    %c0_i32_0 = arith.constant 0 : i32
    %c0_i32_1 = arith.constant 0 : i32
    return %arg0, %c0_i32, %c0_i32_0 : i32, i32, i32
  }
}

</mosaic_0001>

<bundles_post_ra>
// kernel: tile.13
= control target key start
LH: loop header
LB: loop body
LE: loop exit
PB: predicated region body
PF: predicated region fallthrough
CT: control target
= control target key end

     0   :  { %s28_s0 = inlined_call_operand.vmem [shape: f32[4], index: 0, kind: input, shape index: {}]   ;;  %s29_s1 = inlined_call_operand.vmem [shape: f32[16,4], index: 1, kind: output, shape index: {}]  }
   0x1   :  { %v4_v0 = vld [vmem:[%s28_s0] ss:$0 sm:$0xff] }
   0x2   :  { %5 = vst [vmem:[%s29_s1] sm:$0xff] %v4_v0  ;;  %8 = vst [vmem:[%s29_s1 + $0x8] sm:$0xff] %v4_v0 }

// kernel: tile.14
= control target key start
LH: loop header
LB: loop body
LE: loop exit
PB: predicated region body
PF: predicated region fallthrough
CT: control target
= control target key end

     0   :  { %s131_s10 = smov 60   ;;  %s132_s11 = smov 52   ;;  %vm3_vm0 = vcmask 31744   ;;  %vm9_vm1 = vcmask 523744   ;;  %vm15_vm2 = vcmask 490944   ;;  %vm21_vm3 = vcmask 458144   ;;  %s207_s0 = inlined_call_operand.vmem [shape: f32[16,4], index: 0, kind: input, shape index: {}]   ;;  %s208_s1 = inlined_call_operand.vmem [shape: f32[1,64], index: 1, kind: output, shape index: {}]  }
   0x1   :  { %v101_v0 = vld [vmem:[%s207_s0 + $0xf] sm:$0x1]   ;;  %v103_v1 = vld [vmem:[%s207_s0 + $0xd] sm:$0x1]   ;;  %v102_v2 = vld [vmem:[%s207_s0 + $0xe] sm:$0x1]  }
   0x2   :  { %7 = vrot.lane.b32.xlu0 %v101_v0, %s131_s10  ;;  %19 = vrot.lane.b32.xlu1 %v103_v1, %s132_s11  ;;  %v104_v3 = vld [vmem:[%s207_s0 + $0xc] sm:$0x1]   ;;  %s133_s16 = smov 56   ;;  %s134_s17 = smov 48   ;;  %v105_v4 = vld [vmem:[%s207_s0 + $0xb] sm:$0x1]  }
   0x3   :  { %v106_v5 = vld [vmem:[%s207_s0 + $0xa] sm:$0x1]   ;;  %v2_v6 = vld [vmem:[%s207_s0] sm:$0x1]   ;;  %s135_s24 = smov 44   ;;  %s136_s25 = smov 40  }
   0x4   :  { %4 = vst.msk [vmem:[#allocation0] sm:$0x1] %vm3_vm0, %v2_v6   ;;  %v107_v7 = vld [vmem:[%s207_s0 + $0x9] sm:$0x1]   ;;  %v108_v8 = vld [vmem:[%s207_s0 + $0x8] sm:$0x1]  }
   0x5   :  { %s137_s30 = smov 36   ;;  %s138_s2 = smov 32   ;;  %v109_v9 = vld [vmem:[%s207_s0 + $0x7] sm:$0x1]   ;;  %v110_v10 = vld [vmem:[%s207_s0 + $0x6] sm:$0x1]  }
   0x6   :  { %13 = vrot.lane.b32.xlu0 %v102_v2, %s133_s16  ;;  %25 = vrot.lane.b32.xlu1 %v104_v3, %s134_s17  ;;  %s139_s7 = smov 28   ;;  %s140_s8 = smov 24   ;;  %v111_v11 = vld [vmem:[%s207_s0 + $0x5] sm:$0x1]   ;;  %v112_v12 = vld [vmem:[%s207_s0 + $0x4] sm:$0x1]  }
   0x7   :  { %s141_s13 = smov 20   ;;  %s142_s14 = smov 16   ;;  %v113_v13 = vld [vmem:[%s207_s0 + $0x3] sm:$0x1]   ;;  %v114_v14 = vld [vmem:[%s207_s0 + $0x2] sm:$0x1]  }
   0x8   :  { %s143_s19 = smov 12   ;;  %s144_s20 = smov 8   ;;  %v115_v15 = vld [vmem:[%s207_s0 + $0x1] sm:$0x1]   ;;  %vm27_vm4 = vcmask 425344   ;;  %vm33_vm5 = vcmask 392544  }
   0x9   :  { %s145_s0 = smov 4   ;;  %vm39_vm6 = vcmask 359744   ;;  %vm45_vm7 = vcmask 326944   ;;  %vm51_vm8 = vcmask 294144   ;;  %vm57_vm9 = vcmask 261344  }
   0xa   :  { %31 = vrot.lane.b32.xlu0 %v105_v4, %s135_s24  ;;  %37 = vrot.lane.b32.xlu1 %v106_v5, %s136_s25  ;;  %vm63_vm10 = vcmask 228544   ;;  %vm69_vm11 = vcmask 195744   ;;  %vm75_vm12 = vcmask 162944   ;;  %vm81_vm13 = vcmask 130144  }
   0xb   :  { %vm87_vm14 = vcmask 97344   ;;  %vm93_vm15 = vcmask 64544  }
   0xe   :  { %43 = vrot.lane.b32.xlu0 %v107_v7, %s137_s30  ;;  %49 = vrot.lane.b32.xlu1 %v108_v8, %s138_s2 }
  0x12   :  { %55 = vrot.lane.b32.xlu0 %v109_v9, %s139_s7  ;;  %61 = vrot.lane.b32.xlu1 %v110_v10, %s140_s8 }
  0x16   :  { %67 = vrot.lane.b32.xlu0 %v111_v11, %s141_s13  ;;  %73 = vrot.lane.b32.xlu1 %v112_v12, %s142_s14 }
  0x1a   :  { %79 = vrot.lane.b32.xlu0 %v113_v13, %s143_s19  ;;  %85 = vrot.lane.b32.xlu1 %v114_v14, %s144_s20 }
  0x1e   :  { %91 = vrot.lane.b32.xlu0 %v115_v15, %s145_s0 }
  0x74   :  { %v8_v16 = vpop.permute.xlu0 %7   ;;  %v20_v17 = vpop.permute.xlu1 %19  }
  0x75   :  { %10 = vst.msk [vmem:[#allocation0] sm:$0x1] %vm9_vm1, %v8_v16  }
  0x78   :  { %v14_v18 = vpop.permute.xlu0 %13   ;;  %v26_v19 = vpop.permute.xlu1 %25  }
  0x79   :  { %16 = vst.msk [vmem:[#allocation0] sm:$0x1] %vm15_vm2, %v14_v18  }
  0x7a   :  { %22 = vst.msk [vmem:[#allocation0] sm:$0x1] %vm21_vm3, %v20_v17  }
  0x7b   :  { %28 = vst.msk [vmem:[#allocation0] sm:$0x1] %vm27_vm4, %v26_v19  }
  0x7c   :  { %v32_v20 = vpop.permute.xlu0 %31   ;;  %v38_v21 = vpop.permute.xlu1 %37  }
  0x7d   :  { %34 = vst.msk [vmem:[#allocation0] sm:$0x1] %vm33_vm5, %v32_v20  }
  0x7e   :  { %40 = vst.msk [vmem:[#allocation0] sm:$0x1] %vm39_vm6, %v38_v21  }
  0x80   :  { %v44_v22 = vpop.permute.xlu0 %43   ;;  %v50_v23 = vpop.permute.xlu1 %49  }
  0x81   :  { %46 = vst.msk [vmem:[#allocation0] sm:$0x1] %vm45_vm7, %v44_v22  }
  0x82   :  { %52 = vst.msk [vmem:[#allocation0] sm:$0x1] %vm51_vm8, %v50_v23  }
  0x84   :  { %v56_v24 = vpop.permute.xlu0 %55   ;;  %v62_v25 = vpop.permute.xlu1 %61  }
  0x85   :  { %58 = vst.msk [vmem:[#allocation0] sm:$0x1] %vm57_vm9, %v56_v24  }
  0x86   :  { %64 = vst.msk [vmem:[#allocation0] sm:$0x1] %vm63_vm10, %v62_v25  }
  0x88   :  { %v68_v26 = vpop.permute.xlu0 %67   ;;  %v74_v27 = vpop.permute.xlu1 %73  }
  0x89   :  { %70 = vst.msk [vmem:[#allocation0] sm:$0x1] %vm69_vm11, %v68_v26  }
  0x8a   :  { %76 = vst.msk [vmem:[#allocation0] sm:$0x1] %vm75_vm12, %v74_v27  }
  0x8c   :  { %v80_v28 = vpop.permute.xlu0 %79   ;;  %v86_v29 = vpop.permute.xlu1 %85  }
  0x8d   :  { %82 = vst.msk [vmem:[#allocation0] sm:$0x1] %vm81_vm13, %v80_v28  }
  0x8e   :  { %88 = vst.msk [vmem:[#allocation0] sm:$0x1] %vm87_vm14, %v86_v29  }
  0x90   :  { %v92_v30 = vpop.permute.xlu0 %91  }
  0x91   :  { %94 = vst.msk [vmem:[#allocation0] sm:$0x1] %vm93_vm15, %v92_v30  }
  0x98   :  { %v98_v31 = vld [vmem:[#allocation0] sm:$0x1] }
  0x99   :  { %100 = vst [vmem:[%s208_s1] sm:$0x1] %v98_v31 }

// kernel: tile.18
= control target key start
LH: loop header
LB: loop body
LE: loop exit
PB: predicated region body
PF: predicated region fallthrough
CT: control target
= control target key end

     0   :  { %s28_s0 = inlined_call_operand.vmem [shape: f32[8], index: 0, kind: input, shape index: {}]   ;;  %s29_s1 = inlined_call_operand.vmem [shape: f32[16,8], index: 1, kind: output, shape index: {}]  }
   0x1   :  { %v4_v0 = vld [vmem:[%s28_s0] ss:$0 sm:$0xff] }
   0x2   :  { %5 = vst [vmem:[%s29_s1] sm:$0xff] %v4_v0  ;;  %8 = vst [vmem:[%s29_s1 + $0x8] sm:$0xff] %v4_v0 }

// kernel: tile.19
= control target key start
LH: loop header
LB: loop body
LE: loop exit
PB: predicated region body
PF: predicated region fallthrough
CT: control target
= control target key end

     0   :  { %s131_s10 = smov 120   ;;  %s132_s11 = smov 104   ;;  %vm3_vm0 = vcmask 64512   ;;  %vm9_vm1 = vcmask 1048512   ;;  %vm15_vm2 = vcmask 982912   ;;  %vm21_vm3 = vcmask 917312   ;;  %s207_s0 = inlined_call_operand.vmem [shape: f32[16,8], index: 0, kind: input, shape index: {}]   ;;  %s208_s1 = inlined_call_operand.vmem [shape: f32[1,128], index: 1, kind: output, shape index: {}]  }
   0x1   :  { %v101_v0 = vld [vmem:[%s207_s0 + $0xf] sm:$0x1]   ;;  %v103_v1 = vld [vmem:[%s207_s0 + $0xd] sm:$0x1]   ;;  %v102_v2 = vld [vmem:[%s207_s0 + $0xe] sm:$0x1]  }
   0x2   :  { %7 = vrot.lane.b32.xlu0 %v101_v0, %s131_s10  ;;  %19 = vrot.lane.b32.xlu1 %v103_v1, %s132_s11  ;;  %v104_v3 = vld [vmem:[%s207_s0 + $0xc] sm:$0x1]   ;;  %s133_s16 = smov 112   ;;  %s134_s17 = smov 96   ;;  %v105_v4 = vld [vmem:[%s207_s0 + $0xb] sm:$0x1]  }
   0x3   :  { %v106_v5 = vld [vmem:[%s207_s0 + $0xa] sm:$0x1]   ;;  %v2_v6 = vld [vmem:[%s207_s0] sm:$0x1]   ;;  %s135_s24 = smov 88   ;;  %s136_s25 = smov 80  }
   0x4   :  { %4 = vst.msk [vmem:[#allocation0] sm:$0x1] %vm3_vm0, %v2_v6   ;;  %v107_v7 = vld [vmem:[%s207_s0 + $0x9] sm:$0x1]   ;;  %v108_v8 = vld [vmem:[%s207_s0 + $0x8] sm:$0x1]  }
   0x5   :  { %s137_s30 = smov 72   ;;  %s138_s2 = smov 64   ;;  %v109_v9 = vld [vmem:[%s207_s0 + $0x7] sm:$0x1]   ;;  %v110_v10 = vld [vmem:[%s207_s0 + $0x6] sm:$0x1]  }
   0x6   :  { %13 = vrot.lane.b32.xlu0 %v102_v2, %s133_s16  ;;  %25 = vrot.lane.b32.xlu1 %v104_v3, %s134_s17  ;;  %s139_s7 = smov 56   ;;  %s140_s8 = smov 48   ;;  %v111_v11 = vld [vmem:[%s207_s0 + $0x5] sm:$0x1]   ;;  %v112_v12 = vld [vmem:[%s207_s0 + $0x4] sm:$0x1]  }
   0x7   :  { %s141_s13 = smov 40   ;;  %s142_s14 = smov 32   ;;  %v113_v13 = vld [vmem:[%s207_s0 + $0x3] sm:$0x1]   ;;  %v114_v14 = vld [vmem:[%s207_s0 + $0x2] sm:$0x1]  }
   0x8   :  { %s143_s19 = smov 24   ;;  %s144_s20 = smov 16   ;;  %v115_v15 = vld [vmem:[%s207_s0 + $0x1] sm:$0x1]   ;;  %vm27_vm4 = vcmask 851712   ;;  %vm33_vm5 = vcmask 786112  }
   0x9   :  { %s145_s0 = smov 8   ;;  %vm39_vm6 = vcmask 720512   ;;  %vm45_vm7 = vcmask 654912   ;;  %vm51_vm8 = vcmask 589312   ;;  %vm57_vm9 = vcmask 523712  }
   0xa   :  { %31 = vrot.lane.b32.xlu0 %v105_v4, %s135_s24  ;;  %37 = vrot.lane.b32.xlu1 %v106_v5, %s136_s25  ;;  %vm63_vm10 = vcmask 458112   ;;  %vm69_vm11 = vcmask 392512   ;;  %vm75_vm12 = vcmask 326912   ;;  %vm81_vm13 = vcmask 261312  }
   0xb   :  { %vm87_vm14 = vcmask 195712   ;;  %vm93_vm15 = vcmask 130112  }
   0xe   :  { %43 = vrot.lane.b32.xlu0 %v107_v7, %s137_s30  ;;  %49 = vrot.lane.b32.xlu1 %v108_v8, %s138_s2 }
  0x12   :  { %55 = vrot.lane.b32.xlu0 %v109_v9, %s139_s7  ;;  %61 = vrot.lane.b32.xlu1 %v110_v10, %s140_s8 }
  0x16   :  { %67 = vrot.lane.b32.xlu0 %v111_v11, %s141_s13  ;;  %73 = vrot.lane.b32.xlu1 %v112_v12, %s142_s14 }
  0x1a   :  { %79 = vrot.lane.b32.xlu0 %v113_v13, %s143_s19  ;;  %85 = vrot.lane.b32.xlu1 %v114_v14, %s144_s20 }
  0x1e   :  { %91 = vrot.lane.b32.xlu0 %v115_v15, %s145_s0 }
  0x74   :  { %v8_v16 = vpop.permute.xlu0 %7   ;;  %v20_v17 = vpop.permute.xlu1 %19  }
  0x75   :  { %10 = vst.msk [vmem:[#allocation0] sm:$0x1] %vm9_vm1, %v8_v16  }
  0x78   :  { %v14_v18 = vpop.permute.xlu0 %13   ;;  %v26_v19 = vpop.permute.xlu1 %25  }
  0x79   :  { %16 = vst.msk [vmem:[#allocation0] sm:$0x1] %vm15_vm2, %v14_v18  }
  0x7a   :  { %22 = vst.msk [vmem:[#allocation0] sm:$0x1] %vm21_vm3, %v20_v17  }
  0x7b   :  { %28 = vst.msk [vmem:[#allocation0] sm:$0x1] %vm27_vm4, %v26_v19  }
  0x7c   :  { %v32_v20 = vpop.permute.xlu0 %31   ;;  %v38_v21 = vpop.permute.xlu1 %37  }
  0x7d   :  { %34 = vst.msk [vmem:[#allocation0] sm:$0x1] %vm33_vm5, %v32_v20  }
  0x7e   :  { %40 = vst.msk [vmem:[#allocation0] sm:$0x1] %vm39_vm6, %v38_v21  }
  0x80   :  { %v44_v22 = vpop.permute.xlu0 %43   ;;  %v50_v23 = vpop.permute.xlu1 %49  }
  0x81   :  { %46 = vst.msk [vmem:[#allocation0] sm:$0x1] %vm45_vm7, %v44_v22  }
  0x82   :  { %52 = vst.msk [vmem:[#allocation0] sm:$0x1] %vm51_vm8, %v50_v23  }
  0x84   :  { %v56_v24 = vpop.permute.xlu0 %55   ;;  %v62_v25 = vpop.permute.xlu1 %61  }
  0x85   :  { %58 = vst.msk [vmem:[#allocation0] sm:$0x1] %vm57_vm9, %v56_v24  }
  0x86   :  { %64 = vst.msk [vmem:[#allocation0] sm:$0x1] %vm63_vm10, %v62_v25  }
  0x88   :  { %v68_v26 = vpop.permute.xlu0 %67   ;;  %v74_v27 = vpop.permute.xlu1 %73  }
  0x89   :  { %70 = vst.msk [vmem:[#allocation0] sm:$0x1] %vm69_vm11, %v68_v26  }
  0x8a   :  { %76 = vst.msk [vmem:[#allocation0] sm:$0x1] %vm75_vm12, %v74_v27  }
  0x8c   :  { %v80_v28 = vpop.permute.xlu0 %79   ;;  %v86_v29 = vpop.permute.xlu1 %85  }
  0x8d   :  { %82 = vst.msk [vmem:[#allocation0] sm:$0x1] %vm81_vm13, %v80_v28  }
  0x8e   :  { %88 = vst.msk [vmem:[#allocation0] sm:$0x1] %vm87_vm14, %v86_v29  }
  0x90   :  { %v92_v30 = vpop.permute.xlu0 %91  }
  0x91   :  { %94 = vst.msk [vmem:[#allocation0] sm:$0x1] %vm93_vm15, %v92_v30  }
  0x98   :  { %v98_v31 = vld [vmem:[#allocation0] sm:$0x1] }
  0x99   :  { %100 = vst [vmem:[%s208_s1] sm:$0x1] %v98_v31 }

// kernel: res_convblock_forward.1
= control target key start
LH: loop header
LB: loop body
LE: loop exit
PB: predicated region body
PF: predicated region fallthrough
CT: control target
= control target key end

     0   :  { %s1269_s18 = smov 0   ;;  %s1471_s0 = inlined_call_operand.vmem [shape: f32[2,18,72], index: 0, kind: input, shape index: {}]   ;;  %s1472_s1 = inlined_call_operand.vmem [shape: f32[3,72,64], index: 1, kind: input, shape index: {}]   ;;  %s1473_s2 = inlined_call_operand.vmem [shape: f32[1,64], index: 2, kind: input, shape index: {}]   ;;  %s1474_s3 = inlined_call_operand.vmem [shape: f32[3,64,128], index: 3, kind: input, shape index: {}]   ;;  %s1475_s4 = inlined_call_operand.vmem [shape: f32[1,128], index: 4, kind: input, shape index: {}]   ;;  %s1476_s5 = inlined_call_operand.vmem [shape: f32[2,16,128], index: 5, kind: output, shape index: {}]  }
   0x1 LB: > { %s872_s19 = sadd.s32 4294967295, %s1235_s18   ;;  %p876_p0 = scmp.ge.s32.totalorder %s1235_s18, 1  ;;  %s1235_s18 = sphi %s1269_s18, %s15_s18  }
   0x2   : > { %p187_p1 = scmp.lt.s32.totalorder %s1235_s18, 3 }
   0x4   : > { %p188_p2 = pnand %p876_p0, %p187_p1 }
   0x5   : > { %v880_v0 = vld [vmem:[%s1472_s1 + $0x48] sm:$0xff] (!%p188_p2)  ;;  %v881_v1 = vld [vmem:[%s1472_s1 + $0x50] sm:$0xff] (!%p188_p2)  ;;  %v882_v2 = vld [vmem:[%s1472_s1 + $0x58] sm:$0xff] (!%p188_p2)  ;;  %p215_p3 = scmp.lt.s32.totalorder (!%p188_p2), %s872_s19, 1  ;;  %vm248_vm0 = vcmask (!%p188_p2), 588800   ;;  %s1237_s15 = smov (!%p188_p2), 124  }
   0x6   : > { %191 = sbr.rel (%p188_p2) target bundleno = 536 (0x218), region = 40  ;;  %v1114_v3 = vpack.c.bf16 (!%p188_p2), %v881_v1, %v880_v0  ;;  %v883_v4 = vld [vmem:[%s1472_s1 + $0x60] sm:$0xff] (!%p188_p2)  ;;  %v884_v6 = vld [vmem:[%s1472_s1 + $0x68] sm:$0xff] (!%p188_p2)  ;;  %v885_v7 = vld [vmem:[%s1472_s1 + $0x70] sm:$0xff] (!%p188_p2)  ;;  %vm523_vm1 = vcmask (!%p188_p2), 516096   ;;  %v1238_v56 = vmov (!%p188_p2), 0.0  }
   0x7   : > { %v1118_v5 = vpack.c.bf16 (!%p188_p2), %v883_v4, %v882_v2  ;;  %v1122_v8 = vpack.c.bf16 (!%p188_p2), %v885_v7, %v884_v6  ;;  %v886_v9 = vld [vmem:[%s1472_s1 + $0x78] sm:$0xff] (!%p188_p2)  ;;  %v887_v10 = vld [vmem:[%s1472_s1 + $0x80] sm:$0xff] (!%p188_p2)  ;;  %v906_v14 = vld [vmem:[%s1474_s3 + $0x48] sm:$0xff] (!%p188_p2)  ;;  %524 = vst.msk [vmem:[#allocation2] sm:$0x1] (!%p188_p2), %vm523_vm1, %v1238_v56  ;;  %vm526_vm2 = vcmask (!%p188_p2), 523264  }
   0x8   : > { %1115 = vmatprep.subr.bf16.mxu0 (!%p188_p2), %v1114_v3  ;;  %v1126_v12 = vpack.c.bf16 (!%p188_p2), %v887_v10, %v886_v9  ;;  %v905_v13 = vld [vmem:[%s1474_s3 + $0x40] sm:$0xff] (!%p188_p2)  ;;  %v888_v17 = vld [vmem:[%s1472_s1 + $0x88] sm:$0xff] (!%p188_p2)  ;;  %v229_v20 = vld [vmem:[%s1472_s1 + $0x10] sm:$0xff] (!%p188_p2)  ;;  %525 = vst.msk [vmem:[#allocation2 + $0x11] sm:$0x1] (!%p188_p2), %vm523_vm1, %v1238_v56 }
   0x9   : > { %1117 = vmatpush3.bf16.msra.mxu0 (!%p188_p2), %v1114_v3  ;;  %v1162_v16 = vpack.c.bf16 (!%p188_p2), %v906_v14, %v905_v13  ;;  %v227_v18 = vld [vmem:[%s1472_s1] sm:$0xff] (!%p188_p2)  ;;  %v228_v19 = vld [vmem:[%s1472_s1 + $0x8] sm:$0xff] (!%p188_p2)  ;;  %v230_v21 = vld [vmem:[%s1472_s1 + $0x18] sm:$0xff] (!%p188_p2) }
   0xa   : > { %1119 = vmatprep.subr.bf16.mxu0 (!%p188_p2), %v1118_v5  ;;  %v1130_v22 = vpack.c.bf16 (!%p188_p2), %v228_v19, %v227_v18  ;;  %v1134_v23 = vpack.c.bf16 (!%p188_p2), %v230_v21, %v229_v20  ;;  %v231_v25 = vld [vmem:[%s1472_s1 + $0x20] sm:$0xff] (!%p188_p2)  ;;  %v232_v26 = vld [vmem:[%s1472_s1 + $0x28] sm:$0xff] (!%p188_p2)  ;;  %v233_v28 = vld [vmem:[%s1472_s1 + $0x30] sm:$0xff] (!%p188_p2) }
   0xb   : > { %1163 = vmatprep.subr.bf16.mxu1 (!%p188_p2), %v1162_v16  ;;  %v1138_v27 = vpack.c.bf16 (!%p188_p2), %v232_v26, %v231_v25  ;;  %v234_v29 = vld [vmem:[%s1472_s1 + $0x38] sm:$0xff] (!%p188_p2)  ;;  %v235_v31 = vld [vmem:[%s1472_s1 + $0x40] sm:$0xff] (!%p188_p2)  ;;  %v893_v32 = vld [vmem:[%s1472_s1 + $0x90] sm:$0xff] (!%p188_p2) }
   0xc   : > { %1165 = vmatpush3.bf16.msra.mxu1 (!%p188_p2), %v1162_v16  ;;  %v1142_v30 = vpack.c.bf16 (!%p188_p2), %v234_v29, %v233_v28  ;;  %v894_v33 = vld [vmem:[%s1472_s1 + $0x98] sm:$0xff] (!%p188_p2)  ;;  %v895_v34 = vld [vmem:[%s1472_s1 + $0xa0] sm:$0xff] (!%p188_p2)  ;;  %v896_v35 = vld [vmem:[%s1472_s1 + $0xa8] sm:$0xff] (!%p188_p2) }
   0xd   : > { %s1478_s19 = smov (!%p215_p3, %s872_s19), 1  ;;  %1121 = vmatpush3.bf16.msra.mxu0 %v1118_v5  ;;  %v1146_v36 = vpack.c.bf16 %v894_v33, %v893_v32  ;;  %v1150_v38 = vpack.c.bf16 %v896_v35, %v895_v34  ;;  %v897_v40 = vld [vmem:[%s1472_s1 + $0xb0] sm:$0xff]  ;;  %v898_v41 = vld [vmem:[%s1472_s1 + $0xb8] sm:$0xff]  ;;  %v899_v43 = vld [vmem:[%s1472_s1 + $0xc0] sm:$0xff] }
   0xe   : > { %s1218_s7 = smul.u32 24, %s1478_s19  ;;  %1123 = vmatprep.subr.bf16.mxu0 %v1122_v8  ;;  %v1154_v42 = vpack.c.bf16 %v898_v41, %v897_v40  ;;  %v900_v44 = vld [vmem:[%s1472_s1 + $0xc8] sm:$0xff]  ;;  %v901_v46 = vld [vmem:[%s1472_s1 + $0xd0] sm:$0xff]  ;;  %v908_v49 = vld [vmem:[%s1474_s3 + $0x58] sm:$0xff]  ;;  %s930_s13 = sshll.u32 %s1478_s19, 4 }
   0xf   : > { %v1158_v45 = vpack.c.bf16 %v900_v44, %v899_v43  ;;  %v907_v48 = vld [vmem:[%s1474_s3 + $0x50] sm:$0xff]  ;;  %v909_v51 = vld [vmem:[%s1474_s3 + $0x60] sm:$0xff]  ;;  %v910_v52 = vld [vmem:[%s1474_s3 + $0x68] sm:$0xff]  ;;  %s224_s21 = scalar_lea.vmem %s1476_s5, %s930_s13 }
  0x10   : > { %s1307_s14 = scalar_lea.vmem %s1471_s0, %s1218_s7  ;;  %v1166_v50 = vpack.c.bf16 %v908_v49, %v907_v48  ;;  %v1170_v53 = vpack.c.bf16 %v910_v52, %v909_v51  ;;  %v911_v54 = vld [vmem:[%s1474_s3 + $0x70] sm:$0xff]  ;;  %v912_v55 = vld [vmem:[%s1474_s3 + $0x78] sm:$0xff]  ;;  %v531_v58 = vld [vmem:[%s1474_s3] sm:$0xff] }
  0x11   : > { %v236_v11 = vld [vmem:[%s1307_s14 + $0x1] sm:$0xff]  ;;  %1125 = vmatpush3.bf16.msra.mxu0 %v1122_v8  ;;  %v237_v15 = vld [vmem:[%s1307_s14 + $0x9] sm:$0xff]  ;;  %v1174_v57 = vpack.c.bf16 %v912_v55, %v911_v54  ;;  %v904_v62 = vld [vmem:[%s1473_s2] ss:$0 sm:$0xff] }
  0x12   : > { %1012 = vmatprep.mubr.msk.f32.mxu0 %vm248_vm0, %v236_v11  ;;  %515 = vrot.lane.b32.xlu0 %v236_v11, %s1237_s15  ;;  %v225_v24 = vld [vmem:[%s1307_s14] sm:$0xff]  ;;  %v226_v37 = vld [vmem:[%s1307_s14 + $0x8] sm:$0xff]  ;;  %v533_v6 = vld [vmem:[%s1474_s3 + $0x10] sm:$0xff] }
  0x13   : > { %1127 = vmatprep.subr.bf16.mxu0 %v1126_v12  ;;  %v411_v39 = vld [vmem:[%s1307_s14 + $0x2] sm:$0xff]  ;;  %v412_v47 = vld [vmem:[%s1307_s14 + $0xa] sm:$0xff]  ;;  %1167 = vmatprep.subr.bf16.mxu1 %v1166_v50  ;;  %v534_v7 = vld [vmem:[%s1474_s3 + $0x18] sm:$0xff] }
  0x14   : > { %1169 = vmatpush3.bf16.msra.mxu1 %v1166_v50  ;;  %v532_v59 = vld [vmem:[%s1474_s3 + $0x8] sm:$0xff]  ;;  %v1182_v9 = vpack.c.bf16 %v534_v7, %v533_v6  ;;  %v535_v11 = vld [vmem:[%s1474_s3 + $0x20] sm:$0xff]  ;;  %v538_v16 = vld [vmem:[%s1474_s3 + $0x38] sm:$0xff] }
  0x15   : > { %1129 = vmatpush3.bf16.msra.mxu0 %v1126_v12  ;;  %1171 = vmatprep.subr.bf16.mxu1 %v1170_v53  ;;  %v1178_v60 = vpack.c.bf16 %v532_v59, %v531_v58  ;;  %v536_v12 = vld [vmem:[%s1474_s3 + $0x28] sm:$0xff]  ;;  %v917_v18 = vld [vmem:[%s1474_s3 + $0x80] sm:$0xff]  ;;  %v919_v21 = vld [vmem:[%s1474_s3 + $0x90] sm:$0xff] }
  0x16   : > { %517 = vrot.lane.b32.xlu0 %v237_v15, %s1237_s15  ;;  %1010 = vmatprep.subr.mxu0 %v888_v17  ;;  %v1186_v14 = vpack.c.bf16 %v536_v12, %v535_v11  ;;  %v918_v19 = vld [vmem:[%s1474_s3 + $0x88] sm:$0xff]  ;;  %v921_v25 = vld [vmem:[%s1474_s3 + $0xa0] sm:$0xff]  ;;  %v923_v29 = vld [vmem:[%s1474_s3 + $0xb0] sm:$0xff] }
  0x17   : > { %v1194_v20 = vpack.c.bf16 %v918_v19, %v917_v18  ;;  %v922_v26 = vld [vmem:[%s1474_s3 + $0xa8] sm:$0xff]  ;;  %v927_v33 = vld [vmem:[%s1475_s4] ss:$0 sm:$0xff] }
  0x18   : > { %1173 = vmatpush3.bf16.msra.mxu1 %v1170_v53  ;;  %v1202_v28 = vpack.c.bf16 %v922_v26, %v921_v25 }
  0x19   : > { %1011 = vmatpush3.msra.mxu0 %v888_v17  ;;  %1175 = vmatprep.subr.bf16.mxu1 %v1174_v57 }
  0x1a   : > { %1131 = vmatprep.subr.bf16.mxu0 %v1130_v22  ;;  %1013 = vmatmul.mubr.msk.f32.vlgmr.msra.gmra.mrb[0].mxu0 %vm248_vm0, %v237_v15  ;;  %v537_v15 = vld [vmem:[%s1474_s3 + $0x30] sm:$0xff] }
  0x1b   : > { %1133 = vmatpush3.bf16.msra.mxu0 %v1130_v22  ;;  %1033 = vmatprep.mubr.msk.f32.mxu0 %vm248_vm0, %v225_v24  ;;  %v1190_v17 = vpack.c.bf16 %v538_v16, %v537_v15  ;;  %v920_v22 = vld [vmem:[%s1474_s3 + $0x98] sm:$0xff] }
  0x1c   : > { %1135 = vmatprep.subr.bf16.mxu0 %v1134_v23  ;;  %1177 = vmatpush3.bf16.msra.mxu1 %v1174_v57 }
  0x1d   : > { %1179 = vmatprep.subr.bf16.mxu1 %v1178_v60 }
  0x1f   : > { %1137 = vmatpush3.bf16.msra.mxu0 %v1134_v23  ;;  %v1198_v23 = vpack.c.bf16 %v920_v22, %v919_v21 }
  0x20   : > { %1139 = vmatprep.subr.bf16.mxu0 %v1138_v27 }
  0x23   : > { %1141 = vmatpush3.bf16.msra.mxu0 %v1138_v27 }
  0x24   : > { %1143 = vmatprep.subr.bf16.mxu0 %v1142_v30 }
  0x27   : > { %1145 = vmatpush3.bf16.msra.mxu0 %v1142_v30  ;;  %v924_v30 = vld [vmem:[%s1474_s3 + $0xb8] sm:$0xff] }
  0x28   : > { %1031 = vmatprep.subr.mxu0 %v235_v31 }
  0x2b   : > { %1032 = vmatpush3.msra.mxu0 %v235_v31  ;;  %v1206_v31 = vpack.c.bf16 %v924_v30, %v923_v29 }
  0x2c   : > { %1147 = vmatprep.subr.bf16.mxu0 %v1146_v36  ;;  %1034 = vmatmul.mubr.msk.f32.vlgmr.msra.gmra.mrb[0].mxu0 %vm248_vm0, %v226_v37 }
  0x2d   : > { %1149 = vmatpush3.bf16.msra.mxu0 %v1146_v36  ;;  %1054 = vmatprep.mubr.msk.f32.mxu0 %vm248_vm0, %v411_v39 }
  0x2e   : > { %1151 = vmatprep.subr.bf16.mxu0 %v1150_v38 }
  0x31   : > { %1153 = vmatpush3.bf16.msra.mxu0 %v1150_v38 }
  0x32   : > { %1155 = vmatprep.subr.bf16.mxu0 %v1154_v42 }
  0x35   : > { %1157 = vmatpush3.bf16.msra.mxu0 %v1154_v42 }
  0x36   : > { %1159 = vmatprep.subr.bf16.mxu0 %v1158_v45 }
  0x39   : > { %1161 = vmatpush3.bf16.msra.mxu0 %v1158_v45 }
  0x3a   : > { %1052 = vmatprep.subr.mxu0 %v901_v46 }
  0x3d   : > { %1053 = vmatpush3.msra.mxu0 %v901_v46 }
  0x3e   : > { %1055 = vmatmul.mubr.msk.f32.vlgmr.msra.gmra.mrb[0].mxu0 %vm248_vm0, %v412_v47 }
  0x84   : > { %v516_v61 = vpop.permute.xlu0 %515 }
  0x88   : > { %v518_v0 = vpop.permute.xlu0 %517 }
 0x111   : > { %v1056_v63 = vpop.f32.mrb[0].mxu0 }
 0x112   : > { %v514_v1 = vadd.f32 %v1056_v63, %v904_v62  ;;  %v495_v2 = vpop.f32.mrb[1].mxu0 }
 0x113   : > { %v513_v3 = vadd.f32 %v904_v62, %v495_v2 }
 0x114   : > { %v522_v4 = vadd.f32 %v518_v0, %v514_v1 }
 0x115   : > { %v521_v5 = vadd.f32 %v516_v61, %v513_v3 }
 0x116   : > { %528 = vst.msk [vmem:[#allocation2 + $0x9] sm:$0xff] %vm526_vm2, %v522_v4 }
 0x117   : > { %527 = vst.msk [vmem:[#allocation2 + $0x1] sm:$0xff] %vm526_vm2, %v521_v5 }
 0x11d   : > { %v540_v10 = vld [vmem:[#allocation2 + $0x9] sm:$0xff] }
 0x11e   : > { %v539_v8 = vld [vmem:[#allocation2 + $0x1] sm:$0xff]  ;;  %v713_v32 = vld [vmem:[#allocation2 + $0xa] sm:$0xff] }
 0x11f   : > { %1073 = vmatprep.mubr.msk.f32.mxu1 %vm526_vm2, %v539_v8  ;;  %v529_v13 = vld [vmem:[#allocation2] sm:$0xff]  ;;  %v530_v24 = vld [vmem:[#allocation2 + $0x8] sm:$0xff] }
 0x120   : > { %1074 = vmatmul.mubr.msk.f32.vlgmr.msra.gmra.mrb[0].mxu1 %vm526_vm2, %v540_v10  ;;  %v712_v27 = vld [vmem:[#allocation2 + $0x2] sm:$0xff] }
 0x121   : > { %1181 = vmatpush3.bf16.msra.mxu1 %v1178_v60  ;;  %1092 = vmatprep.mubr.msk.f32.mxu1 %vm526_vm2, %v529_v13 }
 0x122   : > { %1183 = vmatprep.subr.bf16.mxu1 %v1182_v9 }
 0x125   : > { %1185 = vmatpush3.bf16.msra.mxu1 %v1182_v9 }
 0x126   : > { %1187 = vmatprep.subr.bf16.mxu1 %v1186_v14 }
 0x129   : > { %1189 = vmatpush3.bf16.msra.mxu1 %v1186_v14 }
 0x12a   : > { %1191 = vmatprep.subr.bf16.mxu1 %v1190_v17 }
 0x12d   : > { %1193 = vmatpush3.bf16.msra.mxu1 %v1190_v17 }
 0x12e   : > { %1195 = vmatprep.subr.bf16.mxu1 %v1194_v20 }
 0x130   : > { %1093 = vmatmul.mubr.msk.f32.vlgmr.msra.gmra.mrb[0].mxu1 %vm526_vm2, %v530_v24 }
 0x131   : > { %1197 = vmatpush3.bf16.msra.mxu1 %v1194_v20  ;;  %1111 = vmatprep.mubr.msk.f32.mxu1 %vm526_vm2, %v712_v27 }
 0x132   : > { %1199 = vmatprep.subr.bf16.mxu1 %v1198_v23 }
 0x135   : > { %1201 = vmatpush3.bf16.msra.mxu1 %v1198_v23 }
 0x136   : > { %1203 = vmatprep.subr.bf16.mxu1 %v1202_v28 }
 0x139   : > { %1205 = vmatpush3.bf16.msra.mxu1 %v1202_v28 }
 0x13a   : > { %1207 = vmatprep.subr.bf16.mxu1 %v1206_v31 }
 0x13d   : > { %1209 = vmatpush3.bf16.msra.mxu1 %v1206_v31 }
 0x140   : > { %1112 = vmatmul.mubr.msk.f32.vlgmr.msra.gmra.mrb[0].mxu1 %vm526_vm2, %v713_v32 }
 0x213   : > { %v1113_v34 = vpop.f32.mrb[0].mxu1 }
 0x214   : > { %v814_v35 = vadd.f32 %v1113_v34, %v927_v33  ;;  %v795_v36 = vpop.f32.mrb[1].mxu1 }
 0x215   : > { %v813_v37 = vadd.f32 %v927_v33, %v795_v36 }
 0x216   : > { %816 = vst [vmem:[%s224_s21 + $0x8] sm:$0xff] %v814_v35 }
 0x217   : > { %815 = vst [vmem:[%s224_s21] sm:$0xff] %v813_v37 }
 0x218 PF: > { %s15_s18 = sadd.s32 1, %s1235_s18  }
 0x219   : > { %p12_p4 = scmp.ge.s32.totalorder %s15_s18, 4  }
 0x21b   :  { %14 = sbr.rel (!%p12_p4) target bundleno = 1 (0x1), region = 74 }

</bundles_post_ra>
